<compile_context>
chip_gen: v6e
topology: v6e:2x2x1
jax: 0.10.0
libtpu: 0.0.40
codegen_flags: <defaults>
</compile_context>

<pallas_src>
import functools

import numpy as np
import jax
import jax.numpy as jnp
from jax import lax
from jax.experimental import pallas as pl
from jax.experimental.pallas import tpu as pltpu


def _binloss_kernel(hard_ref, soft_ref,          # (1, tile_rows, W) VMEM blocks
                    num_ref, den_ref,            # (1, 1, 1) resident accumulators
                    *, rows, tile_rows, blocks_per_split, eps, needs_mask):
    s = pl.program_id(1)     # split index (parallel)
    i = pl.program_id(2)     # row-block index within split (reduction axis)

    # Init the resident accumulators for this (batch, split).
    @pl.when(i == 0)
    def _init():
        num_ref[...] = jnp.zeros_like(num_ref)
        den_ref[...] = jnp.zeros_like(den_ref)

    # Cast per-tile (inputs arrive in their original dtype).
    hard = hard_ref[0].astype(jnp.float32)        # (tile_rows, W)
    soft = soft_ref[0].astype(jnp.float32)        # (tile_rows, W)
    logv = jnp.log(jnp.maximum(soft, eps))        # log(clamp(soft, min=eps))
    hit = hard == 1.0                             # (hard_attention == 1)

    def hot():
        # Full tile: no row masking needed.
        num_ref[...] += jnp.sum(jnp.where(hit, logv, 0.0))
        den_ref[...] += jnp.sum(hard)

    if needs_mask:
        g = s * blocks_per_split + i              # UNclamped global block index
        full = (g + 1) * tile_rows <= rows

        @pl.when(full)
        def _full():
            hot()

        @pl.when(jnp.logical_not(full))
        def _edge():
            # Edge / overflow block: mask out rows past `rows`.  Padded /
            # re-read data is unspecified, so use `where` (NaN-safe).
            tr, lanes = hard.shape
            row = lax.broadcasted_iota(jnp.int32, (tr, lanes), 0)
            valid = (g * tile_rows + row) < rows
            mask = jnp.logical_and(valid, hit)
            num_ref[...] += jnp.sum(jnp.where(mask, logv, 0.0))
            den_ref[...] += jnp.sum(jnp.where(valid, hard, 0.0))
    else:
        hot()


def _round_up(x, m):
    return (x + m - 1) // m * m


@functools.partial(jax.jit, static_argnames=("eps", "max_block_bytes"))
def attention_binarization_loss(hard_attention, soft_attention, eps=1e-12,
                                max_block_bytes=6 * 1024 * 1024):
    """hard_attention / soft_attention: same shape, e.g. (B, 1, H, W). Any dtype."""
    assert hard_attention.shape == soft_attention.shape
    assert hard_attention.ndim >= 2
    shape = hard_attention.shape
    B, W = shape[0], shape[-1]
    R = int(np.prod(shape[1:-1]))

    hard = hard_attention.reshape(B, R, W)
    soft = soft_attention.reshape(B, R, W)

    # Lane-dense relayout (free contiguous reshape) whenever possible.
    LANE = 128
    if (R * W) % LANE == 0:
        R, W = (R * W) // LANE, LANE
        hard = hard.reshape(B, R, W)
        soft = soft.reshape(B, R, W)

    # --- tile sizing (accounts for lane padding of the last dim to 128) ---
    lanes_padded = _round_up(W, LANE)
    hard_row_bytes = hard.dtype.itemsize * lanes_padded
    soft_row_bytes = soft.dtype.itemsize * lanes_padded
    budget_rows = max(1, max_block_bytes // max(hard_row_bytes, soft_row_bytes))
    if budget_rows >= R:
        tile_rows = R
    else:
        # multiple of 32 covers f32/bf16/int8 native sublane tiling
        tile_rows = max(32, (budget_rows // 32) * 32)
        tile_rows = min(tile_rows, R)
    total_blocks = -(-R // tile_rows)

    # --- split the reduction axis when B is too small to feed both v7x cores ---
    n_splits = 2 if (B == 1 and total_blocks >= 2) else 1
    nb = -(-total_blocks // n_splits)                 # blocks per split
    clamp = (n_splits * nb) != total_blocks           # ragged split -> overflow blocks
    needs_mask = (R % tile_rows != 0) or clamp
    G = B * n_splits

    def in_idx(b, s, i):
        g = s * nb + i
        if clamp:
            g = jnp.minimum(g, total_blocks - 1)      # keep DMA in-bounds; kernel masks
        return (b, g, 0)

    def out_idx(b, s, i):
        return (b * n_splits + s, 0, 0)

    kernel = functools.partial(
        _binloss_kernel, rows=R, tile_rows=tile_rows, blocks_per_split=nb,
        eps=float(eps), needs_mask=needs_mask)

    grid_spec = pltpu.PrefetchScalarGridSpec(
        num_scalar_prefetch=0,
        grid=(B, n_splits, nb),
        in_specs=[
            pl.BlockSpec((1, tile_rows, W), in_idx),
            pl.BlockSpec((1, tile_rows, W), in_idx),
        ],
        out_specs=(
            # Constant block index along the reduction axis -> resident
            # accumulator per (batch, split); written back once per (b, s).
            pl.BlockSpec((1, 1, 1), out_idx),
            pl.BlockSpec((1, 1, 1), out_idx),
        ),
    )

    num, den = pl.pallas_call(
        kernel,
        out_shape=(jax.ShapeDtypeStruct((G, 1, 1), jnp.float32),
                   jax.ShapeDtypeStruct((G, 1, 1), jnp.float32)),
        grid_spec=grid_spec,
        compiler_params=pltpu.CompilerParams(
            dimension_semantics=("parallel", "parallel", "arbitrary"),
            vmem_limit_bytes=48 * 1024 * 1024),
    )(hard, soft)

    return -jnp.sum(num) / jnp.sum(den)


def _reference(hard, soft, eps=1e-12):
    h = np.asarray(hard.astype(jnp.float32), np.float64)
    s = np.asarray(soft.astype(jnp.float32), np.float64)
    return -(np.log(np.clip(s, eps, None)) * (h == 1.0)).sum() / h.sum()


if __name__ == "__main__":
    key = jax.random.PRNGKey(0)

    # ---- Test 1: default path (f32 inputs, lane-dense flatten, single block) ----
    B, C, H, W = 2, 1, 48, 80          # (batch, 1, mel frames, text tokens)
    k1, k2, k3, k4 = jax.random.split(key, 4)
    logits = jax.random.normal(k1, (B, C, H, W), dtype=jnp.float32)
    soft = jax.nn.softmax(logits, axis=-1)
    idx = jax.random.randint(k2, (B, C, H), 0, W)
    hard = jax.nn.one_hot(idx, W, dtype=jnp.float32)

    loss1 = jax.block_until_ready(attention_binarization_loss(hard, soft))
    ref1 = _reference(hard, soft)
    assert np.isfinite(float(loss1)), "kernel produced non-finite loss (test 1)"
    np.testing.assert_allclose(float(loss1), float(ref1), rtol=1e-5, atol=1e-5)

    # ---- Test 2: bf16 soft / int8 hard, B==1 (split path), ragged tiles, clamp ----
    B2, C2, H2, W2 = 1, 1, 70, 80
    logits2 = jax.random.normal(k3, (B2, C2, H2, W2), dtype=jnp.float32)
    soft2 = jax.nn.softmax(logits2, axis=-1).astype(jnp.bfloat16)
    idx2 = jax.random.randint(k4, (B2, C2, H2), 0, W2)
    hard2 = jax.nn.one_hot(idx2, W2, dtype=jnp.int8)

    # Tiny block budget to force: multiple row blocks, 2-way split, ragged last
    # block and a clamped overflow block (exercises all masking paths).
    loss2 = jax.block_until_ready(
        attention_binarization_loss(hard2, soft2, max_block_bytes=4096))
    ref2 = _reference(hard2, soft2)
    assert np.isfinite(float(loss2)), "kernel produced non-finite loss (test 2)"
    np.testing.assert_allclose(float(loss2), float(ref2), rtol=1e-5, atol=1e-5)

    print("KERNEL_OK")
</pallas_src>

<mosaic_0001>
module attributes {stable_mosaic.version = 11 : i64} {
  func.func @_binloss_kernel(%arg0: i32, %arg1: i32, %arg2: i32, %arg3: memref<1x30x128xf32, #tpu.memory_space<vmem>>, %arg4: memref<1x30x128xf32, #tpu.memory_space<vmem>>, %arg5: memref<1x1x1xf32, #tpu.memory_space<vmem>>, %arg6: memref<1x1x1xf32, #tpu.memory_space<vmem>>) attributes {dimension_semantics = [#tpu.dimension_semantics<parallel>, #tpu.dimension_semantics<parallel>, #tpu.dimension_semantics<arbitrary>], iteration_bounds = array<i64: 2, 1, 1>, scalar_prefetch = 0 : i64, scratch_operands = 0 : i64, tpu.core_type = #tpu.core_type<tc>, window_params = [{transform_indices = @transform_0, window_bounds = array<i64: 1, 30, 128>}, {transform_indices = @transform_1, window_bounds = array<i64: 1, 30, 128>}, {transform_indices = @transform_2, window_bounds = array<i64: 1, 1, 1>}, {transform_indices = @transform_3, window_bounds = array<i64: 1, 1, 1>}]} {
    %c0_i32 = arith.constant 0 : i32
    %0 = arith.cmpi eq, %arg2, %c0_i32 : i32
    %1 = arith.extui %0 : i1 to i32
    %c0_i32_0 = arith.constant 0 : i32
    %2 = arith.cmpi ne, %1, %c0_i32_0 : i32
    scf.if %2 {
      %cst_22 = arith.constant 0.000000e+00 : f32
      %30 = vector.broadcast %cst_22 : f32 to vector<1x1x1xf32>
      %c0_23 = arith.constant 0 : index
      %c0_24 = arith.constant 0 : index
      %c0_25 = arith.constant 0 : index
      %31 = vector.load %arg5[%c0_23, %c0_24, %c0_25] : memref<1x1x1xf32, #tpu.memory_space<vmem>>, vector<1x1x1xf32>
      tpu.vector_store %arg5[%c0_23, %c0_24, %c0_25], %30 {strides = array<i32>} : memref<1x1x1xf32, #tpu.memory_space<vmem>>, vector<1x1x1xf32>,
      %cst_26 = arith.constant 0.000000e+00 : f32
      %32 = vector.broadcast %cst_26 : f32 to vector<1x1x1xf32>
      %c0_27 = arith.constant 0 : index
      %c0_28 = arith.constant 0 : index
      %c0_29 = arith.constant 0 : index
      %33 = vector.load %arg6[%c0_27, %c0_28, %c0_29] : memref<1x1x1xf32, #tpu.memory_space<vmem>>, vector<1x1x1xf32>
      tpu.vector_store %arg6[%c0_27, %c0_28, %c0_29], %32 {strides = array<i32>} : memref<1x1x1xf32, #tpu.memory_space<vmem>>, vector<1x1x1xf32>,
    } else {
    }
    %c0 = arith.constant 0 : index
    %c0_1 = arith.constant 0 : index
    %c0_2 = arith.constant 0 : index
    %3 = vector.load %arg3[%c0, %c0_1, %c0_2] : memref<1x30x128xf32, #tpu.memory_space<vmem>>, vector<1x30x128xf32>
    %4 = vector.shape_cast %3 : vector<1x30x128xf32> to vector<30x128xf32>
    %c0_3 = arith.constant 0 : index
    %c0_4 = arith.constant 0 : index
    %c0_5 = arith.constant 0 : index
    %5 = vector.load %arg4[%c0_3, %c0_4, %c0_5] : memref<1x30x128xf32, #tpu.memory_space<vmem>>, vector<1x30x128xf32>
    %6 = vector.shape_cast %5 : vector<1x30x128xf32> to vector<30x128xf32>
    %cst = arith.constant 9.99999996E-13 : f32
    %7 = vector.broadcast %cst : f32 to vector<30x128xf32>
    %8 = arith.maximumf %6, %7 : vector<30x128xf32>
    %9 = math.log %8 : vector<30x128xf32>
    %cst_6 = arith.constant 1.000000e+00 : f32
    %10 = vector.broadcast %cst_6 : f32 to vector<30x128xf32>
    %11 = arith.cmpf oeq, %4, %10 : vector<30x128xf32>
    %c0_7 = arith.constant 0 : index
    %c0_8 = arith.constant 0 : index
    %c0_9 = arith.constant 0 : index
    %12 = vector.load %arg5[%c0_7, %c0_8, %c0_9] : memref<1x1x1xf32, #tpu.memory_space<vmem>>, vector<1x1x1xf32>
    %cst_10 = arith.constant 0.000000e+00 : f32
    %13 = vector.broadcast %cst_10 : f32 to vector<30x128xf32>
    %14 = arith.select %11, %9, %13 : vector<30x128xi1>, vector<30x128xf32>
    %15 = vector.shape_cast %14 : vector<30x128xf32> to vector<1x30x128xf32>
    %cst_11 = arith.constant dense<0.000000e+00> : vector<1xf32>
    %16 = vector.multi_reduction <add>, %15, %cst_11 [1, 2] : vector<1x30x128xf32> to vector<1xf32>
    %17 = vector.shape_cast %16 : vector<1xf32> to vector<1x1x1xf32>
    %18 = vector.extract %17[0, 0, 0] : f32 from vector<1x1x1xf32>
    %19 = vector.broadcast %18 : f32 to vector<1x1x1xf32>
    %20 = arith.addf %12, %19 : vector<1x1x1xf32>
    %c0_12 = arith.constant 0 : index
    %c0_13 = arith.constant 0 : index
    %c0_14 = arith.constant 0 : index
    %21 = vector.load %arg5[%c0_12, %c0_13, %c0_14] : memref<1x1x1xf32, #tpu.memory_space<vmem>>, vector<1x1x1xf32>
    tpu.vector_store %arg5[%c0_12, %c0_13, %c0_14], %20 {strides = array<i32>} : memref<1x1x1xf32, #tpu.memory_space<vmem>>, vector<1x1x1xf32>,
    %c0_15 = arith.constant 0 : index
    %c0_16 = arith.constant 0 : index
    %c0_17 = arith.constant 0 : index
    %22 = vector.load %arg6[%c0_15, %c0_16, %c0_17] : memref<1x1x1xf32, #tpu.memory_space<vmem>>, vector<1x1x1xf32>
    %23 = vector.shape_cast %4 : vector<30x128xf32> to vector<1x30x128xf32>
    %cst_18 = arith.constant dense<0.000000e+00> : vector<1xf32>
    %24 = vector.multi_reduction <add>, %23, %cst_18 [1, 2] : vector<1x30x128xf32> to vector<1xf32>
    %25 = vector.shape_cast %24 : vector<1xf32> to vector<1x1x1xf32>
    %26 = vector.extract %25[0, 0, 0] : f32 from vector<1x1x1xf32>
    %27 = vector.broadcast %26 : f32 to vector<1x1x1xf32>
    %28 = arith.addf %22, %27 : vector<1x1x1xf32>
    %c0_19 = arith.constant 0 : index
    %c0_20 = arith.constant 0 : index
    %c0_21 = arith.constant 0 : index
    %29 = vector.load %arg6[%c0_19, %c0_20, %c0_21] : memref<1x1x1xf32, #tpu.memory_space<vmem>>, vector<1x1x1xf32>
    tpu.vector_store %arg6[%c0_19, %c0_20, %c0_21], %28 {strides = array<i32>} : memref<1x1x1xf32, #tpu.memory_space<vmem>>, vector<1x1x1xf32>,
    return
  }
  func.func @transform_0(%arg0: i32, %arg1: i32, %arg2: i32) -> (i32, i32, i32) {
    %c1_i32 = arith.constant 1 : i32
    %0 = arith.muli %arg1, %c1_i32 : i32
    %1 = arith.addi %0, %arg2 : i32
    %c0_i32 = arith.constant 0 : i32
    %c0_i32_0 = arith.constant 0 : i32
    return %arg0, %1, %c0_i32 : i32, i32, i32
  }
  func.func @transform_1(%arg0: i32, %arg1: i32, %arg2: i32) -> (i32, i32, i32) {
    %c1_i32 = arith.constant 1 : i32
    %0 = arith.muli %arg1, %c1_i32 : i32
    %1 = arith.addi %0, %arg2 : i32
    %c0_i32 = arith.constant 0 : i32
    %c0_i32_0 = arith.constant 0 : i32
    return %arg0, %1, %c0_i32 : i32, i32, i32
  }
  func.func @transform_2(%arg0: i32, %arg1: i32, %arg2: i32) -> (i32, i32, i32) {
    %c1_i32 = arith.constant 1 : i32
    %0 = arith.muli %arg0, %c1_i32 : i32
    %1 = arith.addi %0, %arg1 : i32
    %c0_i32 = arith.constant 0 : i32
    %c0_i32_0 = arith.constant 0 : i32
    %c0_i32_1 = arith.constant 0 : i32
    return %1, %c0_i32, %c0_i32_0 : i32, i32, i32
  }
  func.func @transform_3(%arg0: i32, %arg1: i32, %arg2: i32) -> (i32, i32, i32) {
    %c1_i32 = arith.constant 1 : i32
    %0 = arith.muli %arg0, %c1_i32 : i32
    %1 = arith.addi %0, %arg1 : i32
    %c0_i32 = arith.constant 0 : i32
    %c0_i32_0 = arith.constant 0 : i32
    %c0_i32_1 = arith.constant 0 : i32
    return %1, %c0_i32, %c0_i32_0 : i32, i32, i32
  }
}

</mosaic_0001>

<bundles_post_ra>
// kernel: attention_binarization_loss.1
= control target key start
LH: loop header
LB: loop body
LE: loop exit
PB: predicated region body
PF: predicated region fallthrough
CT: control target
= control target key end

     0   :  { %s551_s12 = smov 0   ;;  %s553_s13 = smov 0   ;;  %s599_s0 = inlined_call_operand.vmem [shape: f32[2,30,128], index: 0, kind: input, shape index: {}]   ;;  %s600_s1 = inlined_call_operand.vmem [shape: f32[2,30,128], index: 1, kind: input, shape index: {}]   ;;  %s601_s2 = inlined_call_operand.vmem [shape: f32[2,1,1], index: 2, kind: output, shape index: {0}]   ;;  %s602_s3 = inlined_call_operand.vmem [shape: f32[2,1,1], index: 3, kind: output, shape index: {1}]  }
   0x1   :  { %s555_s14 = smov 0  }
   0x2 LB: > { %s33_s15 = sadd.s32 1, %s524_s13  ;;  %p460_p0 = scmp.ge.s32.totalorder %s528_s14, 1  ;;  %s528_s14 = sphi %s555_s14, %s14_s14   ;;  %s524_s13 = sphi %s553_s13, %s604_s13   ;;  %s520_s12 = sphi %s551_s12, %s603_s12  }
   0x3   : > { %p35_p1 = scmp.ge.s32.totalorder %s33_s15, 2  ;;  %p195_p2 = scmp.lt.s32.totalorder %s528_s14, 3 }
   0x5   : > { %s606_s15 = smov (%p35_p1, %s33_s15), 0  ;;  %p196_p3 = pnand %p460_p0, %p195_p2 }
   0x6   : > { %p239_p4 = scmp.lt.s32.totalorder (!%p196_p3), %s520_s12, 1 }
   0x7   : > { %199 = sbr.rel (%p196_p3) target bundleno = 250 (0xfa), region = 28 }
   0xc   : > { %s608_s12 = smov (!%p239_p4, %s520_s12), 1  ;;  %vm309_vm4 = vcmask 1045504   ;;  %vm275_vm5 = vcmask 0   ;;  %v530_v32 = vmov 0.0  }
   0xd   : > { %s467_s16 = sshll.u32 %s608_s12, 5  ;;  %s264_s25 = scalar_lea.vmem %s601_s2, %s608_s12 }
   0xe   : > { %s258_s19 = scalar_lea.vmem %s600_s1, %s467_s16  ;;  %s246_s22 = scalar_lea.vmem %s599_s0, %s467_s16  ;;  %276 = vst.msk [vmem:[%s264_s25] sm:$0x1] %vm275_vm5, %v530_v32 }
   0xf   : > { %v282_v0 = vld [vmem:[%s258_s19] sm:$0xff]  ;;  %v283_v1 = vld [vmem:[%s258_s19 + $0x8] sm:$0xff]  ;;  %v284_v2 = vld [vmem:[%s258_s19 + $0x10] sm:$0xff]  ;;  %s269_s28 = scalar_lea.vmem %s602_s3, %s608_s12 }
  0x10   : > { %v285_v3 = vld [vmem:[%s258_s19 + $0x18] sm:$0x3f]  ;;  %v286_v4 = vmax.f32 %v282_v0, 1e-12  ;;  %v287_v5 = vmax.f32 %v283_v1, 1e-12 }
  0x11   : > { %v288_v6 = vmax.f32 %v284_v2, 1e-12  ;;  %v289_v7 = vmax.f32 %v285_v3, 1e-12  ;;  %v278_v8 = vld [vmem:[%s246_s22] sm:$0xff]  ;;  %v279_v9 = vld [vmem:[%s246_s22 + $0x8] sm:$0xff] }
  0x12   : > { %498 = vlog2.f32 %v286_v4  ;;  %v280_v10 = vld [vmem:[%s246_s22 + $0x10] sm:$0xff]  ;;  %v281_v12 = vld [vmem:[%s246_s22 + $0x18] sm:$0x3f]  ;;  %vm298_vm0 = vcmp.eq.f32.partialorder %v278_v8, 1.0  ;;  %vm299_vm1 = vcmp.eq.f32.partialorder %v279_v9, 1.0  ;;  %v326_v20 = vadd.f32 %v279_v9, %v278_v8 }
  0x13   : > { %500 = vlog2.f32 %v287_v5  ;;  %vm300_vm2 = vcmp.eq.f32.partialorder %v280_v10, 1.0  ;;  %vm301_vm3 = vcmp.eq.f32.partialorder %v281_v12, 1.0  ;;  %v328_v29 = vsel %vm309_vm4, %v281_v12, 0.0  ;;  %277 = vst.msk [vmem:[%s269_s28] sm:$0x1] %vm275_vm5, %v530_v32 }
  0x14   : > { %502 = vlog2.f32 %v288_v6  ;;  %v327_v28 = vadd.f32 %v326_v20, %v280_v10 }
  0x15   : > { %504 = vlog2.f32 %v289_v7  ;;  %v302_v47 = vld [vmem:[%s264_s25] sm:$0x1] }
  0x16   : > { %v329_v31 = vadd.f32 %v328_v29, %v327_v28 }
  0x1a   : > { %v325_v50 = vld [vmem:[%s269_s28] sm:$0x1] }
  0x1f   : > { %v499_v11 = vpop.eup %498 }
  0x20   : > { %v501_v13 = vpop.eup %500  ;;  %v291_v14 = vmul.f32 0.6931472, %v499_v11 }
  0x21   : > { %v503_v15 = vpop.eup %502  ;;  %v293_v16 = vmul.f32 0.6931472, %v501_v13 }
  0x22   : > { %v505_v17 = vpop.eup %504  ;;  %v295_v18 = vmul.f32 0.6931472, %v503_v15  ;;  %v303_v19 = vsel %vm298_vm0, %v291_v14, 0.0 }
  0x23   : > { %v297_v21 = vmul.f32 0.6931472, %v505_v17  ;;  %v304_v22 = vsel %vm299_vm1, %v293_v16, 0.0 }
  0x24   : > { %v305_v23 = vsel %vm300_vm2, %v295_v18, 0.0  ;;  %v307_v24 = vadd.f32 %v304_v22, %v303_v19 }
  0x25   : > { %v306_v25 = vsel %vm301_vm3, %v297_v21, 0.0 }
  0x26   : > { %v308_v26 = vadd.f32 %v307_v24, %v305_v23  ;;  %v310_v27 = vsel %vm309_vm4, %v306_v25, 0.0 }
  0x28   : > { %v311_v30 = vadd.f32 %v310_v27, %v308_v26 }
  0x2a   : > { %312 = vadd.xlane.f32.xlu0 %v311_v30 }
  0x2e   : > { %330 = vadd.xlane.f32.xlu0 %v329_v31 }
  0xb3   : > { %v313_v33 = vpop.xlane.xlu0 %312 }
  0xb4   : > { %v314_v34 = vrot.slane %v313_v33, 4 }
  0xb6   : > { %v315_v35 = vadd.f32 %v314_v34, %v313_v33 }
  0xb7   : > { %v331_v36 = vpop.xlane.xlu0 %330 }
  0xb8   : > { %v316_v37 = vrot.slane %v315_v35, 2  ;;  %v332_v38 = vrot.slane %v331_v36, 4 }
  0xba   : > { %v333_v39 = vadd.f32 %v332_v38, %v331_v36  ;;  %v317_v40 = vadd.f32 %v316_v37, %v315_v35 }
  0xbc   : > { %v334_v41 = vrot.slane %v333_v39, 2  ;;  %v318_v42 = vrot.slane %v317_v40, 1 }
  0xbe   : > { %v335_v43 = vadd.f32 %v334_v41, %v333_v39  ;;  %v319_v44 = vadd.f32 %v318_v42, %v317_v40 }
  0xc0   : > { %469 = vpush %v319_v44  ;;  %v336_v45 = vrot.slane %v335_v43, 1 }
  0xc2   : > { %v337_v46 = vadd.f32 %v336_v45, %v335_v43 }
  0xc4   : > { %471 = vpush %v337_v46 }
  0xf1   : > { %s470_s29 = spop %469 }
  0xf2   : > { %v321_v48 = vstv %s470_s29 }
  0xf3   : > { %v322_v49 = vadd.f32 %v321_v48, %v302_v47 }
  0xf5   : > { %324 = vst.msk [vmem:[%s264_s25] sm:$0x1] %vm275_vm5, %v322_v49  ;;  %s472_s30 = spop %471 }
  0xf6   : > { %v339_v51 = vstv %s472_s30 }
  0xf7   : > { %v340_v52 = vadd.f32 %v339_v51, %v325_v50 }
  0xf9   : > { %341 = vst.msk [vmem:[%s269_s28] sm:$0x1] %vm275_vm5, %v340_v52 }
  0xfa PF: > { %s14_s14 = sadd.s32 1, %s528_s14   ;;  %s603_s12 = smov %s524_s13 }
  0xfb   : > { %p11_p5 = scmp.ge.s32.totalorder %s14_s14, 4   ;;  %s604_s13 = smov %s606_s15 }
  0xfd   :  { %13 = sbr.rel (!%p11_p5) target bundleno = 2 (0x2), region = 77 }

</bundles_post_ra>
